<compile_context>
chip_gen: v5e
topology: v5e:2x2
jax: 0.10.0
libtpu: 0.0.40
codegen_flags: <defaults>
</compile_context>

<pallas_src>
import functools

import jax
import jax.numpy as jnp
import numpy as np
from jax import lax
from jax.experimental import pallas as pl
from jax.experimental.pallas import tpu as pltpu


# ----------------------------------------------------------------------------
# helpers
# ----------------------------------------------------------------------------
def _round_up(x, m):
    return ((x + m - 1) // m) * m


def _pad_axis(a, axis, new_size):
    pads = [(0, 0)] * a.ndim
    pads[axis] = (0, new_size - a.shape[axis])
    return jnp.pad(a, pads)


def _vmem_limit(block_bytes):
    """Scoped-VMEM request: 1.5x the computed block footprint, clamped to
    [32 MiB, 64 MiB] (>= every gen's default, <= v7x's physical VMEM)."""
    return int(min(max(int(block_bytes * 1.5) + (1 << 20), 32 << 20), 64 << 20))


def _const_block_spec(shape):
    """Constant-index block; single-buffered when pipeline_mode is available."""
    idx = lambda b, t: tuple(0 for _ in shape)
    try:
        return pl.BlockSpec(shape, idx, pipeline_mode=pl.Buffered(1))
    except TypeError:           # older BlockSpec without pipeline_mode kwarg
        return pl.BlockSpec(shape, idx)


# ----------------------------------------------------------------------------
# Tiled matmul + bias:  out[M,N] = x[M,K] @ w[K,N] + b[1,N]
# Used for (a) the hoisted GRU input-projection GEMM and (b) the vocab proj.
# ----------------------------------------------------------------------------
def _matmul_bias_kernel_acc(x_ref, w_ref, b_ref, o_ref, acc_ref):
    @pl.when(pl.program_id(2) == 0)
    def _():
        acc_ref[...] = jnp.zeros_like(acc_ref)

    acc_ref[...] += jnp.dot(x_ref[...], w_ref[...],
                            preferred_element_type=jnp.float32)

    @pl.when(pl.program_id(2) == pl.num_programs(2) - 1)
    def _():
        o_ref[...] = (acc_ref[...] + b_ref[...]).astype(o_ref.dtype)


def _matmul_bias_kernel_singlek(x_ref, w_ref, b_ref, o_ref):
    o_ref[...] = (jnp.dot(x_ref[...], w_ref[...],
                          preferred_element_type=jnp.float32)
                  + b_ref[...]).astype(o_ref.dtype)


def pallas_linear(x, w, b, *, tm=256, tn=512, tk=512, out_dtype=jnp.float32):
    """x:[M,K], w:[K,N], b:[1,N] f32 -> [M,N] out_dtype."""
    M, K = x.shape
    N = w.shape[1]
    tm = min(tm, _round_up(M, 8))
    tn = min(tn, _round_up(N, 128))
    tk = min(tk, _round_up(K, 128))
    Mp, Kp, Np = _round_up(M, tm), _round_up(K, tk), _round_up(N, tn)

    xp = jnp.pad(x, ((0, Mp - M), (0, Kp - K)))
    wp = jnp.pad(w, ((0, Kp - K), (0, Np - N)))
    bp = jnp.pad(b, ((0, 0), (0, Np - N)))

    out_itemsize = jnp.dtype(out_dtype).itemsize
    cost = pl.CostEstimate(
        flops=int(2 * Mp * Np * Kp), transcendentals=0,
        bytes_accessed=int(xp.size * xp.dtype.itemsize
                           + wp.size * wp.dtype.itemsize
                           + bp.size * bp.dtype.itemsize
                           + Mp * Np * out_itemsize))
    blk_bytes = (tm * tk * xp.dtype.itemsize + tk * tn * wp.dtype.itemsize
                 + tn * 4 + tm * tn * out_itemsize)

    if Kp == tk:
        # single K tile: no accumulator scratch, no reduction grid axis
        out = pl.pallas_call(
            _matmul_bias_kernel_singlek,
            out_shape=jax.ShapeDtypeStruct((Mp, Np), out_dtype),
            grid_spec=pltpu.PrefetchScalarGridSpec(
                num_scalar_prefetch=0,
                grid=(Mp // tm, Np // tn),
                in_specs=[
                    pl.BlockSpec((tm, tk), lambda i, j: (i, 0)),
                    pl.BlockSpec((tk, tn), lambda i, j: (0, j)),
                    pl.BlockSpec((1, tn), lambda i, j: (0, j)),
                ],
                out_specs=pl.BlockSpec((tm, tn), lambda i, j: (i, j)),
            ),
            compiler_params=pltpu.CompilerParams(
                dimension_semantics=("parallel", "parallel"),
                vmem_limit_bytes=_vmem_limit(2 * blk_bytes)),
            cost_estimate=cost,
        )(xp, wp, bp)
    else:
        out = pl.pallas_call(
            _matmul_bias_kernel_acc,
            out_shape=jax.ShapeDtypeStruct((Mp, Np), out_dtype),
            grid_spec=pltpu.PrefetchScalarGridSpec(
                num_scalar_prefetch=0,
                grid=(Mp // tm, Np // tn, Kp // tk),
                in_specs=[
                    pl.BlockSpec((tm, tk), lambda i, j, k: (i, k)),
                    pl.BlockSpec((tk, tn), lambda i, j, k: (k, j)),
                    pl.BlockSpec((1, tn), lambda i, j, k: (0, j)),
                ],
                out_specs=pl.BlockSpec((tm, tn), lambda i, j, k: (i, j)),
                scratch_shapes=[pltpu.VMEM((tm, tn), jnp.float32)],
            ),
            compiler_params=pltpu.CompilerParams(
                dimension_semantics=("parallel", "parallel", "arbitrary"),
                vmem_limit_bytes=_vmem_limit(2 * blk_bytes + tm * tn * 4)),
            cost_estimate=cost,
        )(xp, wp, bp)
    return out[:M, :N]


# ----------------------------------------------------------------------------
# GRU recurrence kernel: one grid step == TT timesteps (blocked + unrolled).
# gi_ref : [TT, Bblk, 3*Hp] bf16  precomputed input projections (+ r/z biases)
# whh_ref: [Hp, 3*Hp]       bf16  fused recurrent weights (r|z|n columns)
# bhn_ref: [1, Hp]          f32   recurrent bias of the n gate
# Grid: (batch_splits "parallel", time_blocks "arbitrary").
# ----------------------------------------------------------------------------
def _gru_kernel(gi_ref, whh_ref, bhn_ref, h_all_ref, h_state, *, tt, hp):
    @pl.when(pl.program_id(1) == 0)
    def _():
        h_state[...] = jnp.zeros_like(h_state)

    whh = whh_ref[...]                                      # loaded once/block
    bhn_b = jnp.broadcast_to(bhn_ref[...], (h_state.shape[0], hp))  # hoisted

    def step(i, h):
        gi = gi_ref[i].astype(jnp.float32)                  # [Bblk, 3Hp]
        gh = jnp.dot(h.astype(jnp.bfloat16), whh,
                     preferred_element_type=jnp.float32)    # one MXU push/step
        r = jax.nn.sigmoid(gi[:, :hp] + gh[:, :hp])
        z = jax.nn.sigmoid(gi[:, hp:2 * hp] + gh[:, hp:2 * hp])
        n = jnp.tanh(gi[:, 2 * hp:] + r * (gh[:, 2 * hp:] + bhn_b))
        h_new = n + z * (h - n)
        h_all_ref[i] = h_new.astype(h_all_ref.dtype)        # bf16 store
        return h_new

    h_state[...] = lax.fori_loop(0, tt, step, h_state[...], unroll=True)


def gru_recurrence(gi, whh_cat, bhn, *, tt):
    """gi: [Tp, Bp, 3*Hp] bf16 (Tp % tt == 0). Returns h_all [Tp, Bp, Hp] bf16."""
    Tp, Bp, three_hp = gi.shape
    Hp = three_hp // 3
    n_blocks = Tp // tt
    b_splits = 2 if (Bp % 16 == 0) else 1   # v7x: one batch half per TC
    Bblk = Bp // b_splits

    kernel = functools.partial(_gru_kernel, tt=tt, hp=Hp)

    gi_blk = tt * Bblk * three_hp * gi.dtype.itemsize
    out_blk = tt * Bblk * Hp * 2
    whh_blk = Hp * three_hp * whh_cat.dtype.itemsize
    needed = 2 * gi_blk + 2 * out_blk + whh_blk + Hp * 4 + Bblk * Hp * 4

    grid_spec = pltpu.PrefetchScalarGridSpec(
        num_scalar_prefetch=0,
        grid=(b_splits, n_blocks),
        in_specs=[
            pl.BlockSpec((tt, Bblk, three_hp), lambda b, t: (t, b, 0)),
            _const_block_spec((Hp, three_hp)),
            _const_block_spec((1, Hp)),
        ],
        out_specs=pl.BlockSpec((tt, Bblk, Hp), lambda b, t: (t, b, 0)),
        scratch_shapes=[pltpu.VMEM((Bblk, Hp), jnp.float32)],
    )
    return pl.pallas_call(
        kernel,
        out_shape=jax.ShapeDtypeStruct((Tp, Bp, Hp), jnp.bfloat16),
        grid_spec=grid_spec,
        compiler_params=pltpu.CompilerParams(
            dimension_semantics=("parallel", "arbitrary"),
            vmem_limit_bytes=_vmem_limit(needed)),
        cost_estimate=pl.CostEstimate(
            flops=int(2 * Tp * Bp * Hp * three_hp),
            transcendentals=int(3 * Tp * Bp * Hp),
            bytes_accessed=int(gi.size * gi.dtype.itemsize
                               + whh_cat.size * 2 + bhn.size * 4
                               + Tp * Bp * Hp * 2)),
    )(gi, whh_cat, bhn)


# ----------------------------------------------------------------------------
# Parameter preparation: fuse gate weights, fold biases, pad, cast to bf16.
# ----------------------------------------------------------------------------
def prepare_params(raw):
    embed_w, wih, whh, bih, bhh, lin_w_t, lin_b = raw
    E, H = wih.shape[1], wih.shape[2]
    Hp = _round_up(H, 128)

    wih_cat = jnp.concatenate([_pad_axis(wih[g], 1, Hp) for g in range(3)], 1)
    whh_cat = jnp.concatenate(
        [_pad_axis(_pad_axis(whh[g], 0, Hp), 1, Hp) for g in range(3)], 1)

    # Fold recurrent biases of r/z into the input-side bias; bhh_n stays
    # separate because of r * (h @ Whh_n + bhh_n).
    b_r = (bih[0] + bhh[0])[None, :]
    b_z = (bih[1] + bhh[1])[None, :]
    b_n = bih[2][None, :]
    b_gi = jnp.concatenate([_pad_axis(b_r, 1, Hp),
                            _pad_axis(b_z, 1, Hp),
                            _pad_axis(b_n, 1, Hp)], axis=1)        # [1, 3Hp]
    bhn = _pad_axis(bhh[2][None, :], 1, Hp)                        # [1, Hp]

    lin_w = _pad_axis(lin_w_t, 0, Hp)                              # [Hp, V]

    return dict(
        embed_w=embed_w,
        wih_cat=wih_cat.astype(jnp.bfloat16),
        whh_cat=whh_cat.astype(jnp.bfloat16),
        b_gi=b_gi.astype(jnp.float32),
        bhn=bhn.astype(jnp.float32),
        lin_w=lin_w.astype(jnp.bfloat16),
        lin_b=lin_b[None, :].astype(jnp.float32),
        E=E, H=H, Hp=Hp,
    )


# ----------------------------------------------------------------------------
# pack_padded_sequence(enforce_sorted=False) data ordering (host-side).
# Used by the pure-JAX reference.
# ----------------------------------------------------------------------------
def packed_indices(lengths, T):
    lengths = np.asarray(lengths)
    order = np.argsort(-lengths, kind="stable")   # batch sorted by length desc
    b_idx, t_idx = [], []
    for t in range(T):
        for b in order:
            if lengths[b] > t:
                b_idx.append(int(b))
                t_idx.append(t)
    return np.array(b_idx, np.int32), np.array(t_idx, np.int32)


# ----------------------------------------------------------------------------
# Full Decoder.forward
# ----------------------------------------------------------------------------
def decoder_forward(prep, features, captions, lengths, *, tt=16):
    """features [B, E] f32, captions [B, max_len] i32, lengths host list.
    Returns logits [sum(lengths), vocab_size] f32, in packed order."""
    Hp = prep["Hp"]

    # --- glue: sort batch by descending length (pack_padded_sequence order) ---
    lengths_np = np.asarray(lengths)
    order = np.argsort(-lengths_np, kind="stable")
    feats = jnp.take(features, jnp.asarray(order, dtype=jnp.int32), axis=0)
    caps = jnp.take(captions, jnp.asarray(order, dtype=jnp.int32), axis=0)

    # --- glue: embedding lookup + feature concat (plain JAX) ---
    cap = caps[:, :-1]                                         # [B, max_len-1]
    emb = jnp.take(prep["embed_w"], cap, axis=0)               # [B, max_len-1, E]
    inputs = jnp.concatenate([feats[:, None, :], emb], 1)      # [B, T, E]
    B, T, E = inputs.shape

    tt = max(1, min(tt, T))
    Bp = _round_up(B, 8)          # sublane alignment
    Tp = _round_up(T, tt)         # whole timestep blocks
    x = jnp.pad(inputs, ((0, Bp - B), (0, Tp - T), (0, 0)))
    x = jnp.transpose(x, (1, 0, 2))                            # [Tp, Bp, E]

    # --- hot path 1: hoisted input-projection GEMM (bf16 output) ---
    gi = pallas_linear(x.reshape(Tp * Bp, E).astype(jnp.bfloat16),
                       prep["wih_cat"], prep["b_gi"],
                       out_dtype=jnp.bfloat16)                 # [Tp*Bp, 3Hp]
    gi = gi.reshape(Tp, Bp, 3 * Hp)

    # --- hot path 2: sequential GRU recurrence (h @ Whh only) ---
    h_all = gru_recurrence(gi, prep["whh_cat"], prep["bhn"], tt=tt)  # bf16

    # --- glue: packed rows == per-timestep prefix slices of the sorted batch
    cnts = [int((lengths_np > t).sum()) for t in range(T)]
    h_packed = jnp.concatenate(
        [h_all[t, :c] for t, c in enumerate(cnts) if c > 0], axis=0)  # [sum_len, Hp]

    # --- hot path 3: tiled vocab projection (lane-dense, wide N tiles) ---
    logits = pallas_linear(h_packed, prep["lin_w"], prep["lin_b"],
                           tm=256, tn=1024, tk=512)            # [sum_len, V] f32
    return logits


# ----------------------------------------------------------------------------
# Pure-JAX reference mirroring the same numerics (bf16 matmul inputs, f32 acc,
# f32 gate math) on the UNsorted inputs + explicit packed gather.
# ----------------------------------------------------------------------------
def decoder_forward_ref(raw, features, captions, lengths):
    embed_w, wih, whh, bih, bhh, lin_w_t, lin_b = raw
    H = whh.shape[-1]

    cap = captions[:, :-1]
    emb = jnp.take(embed_w, cap, axis=0)
    inputs = jnp.concatenate([features[:, None, :], emb], axis=1)
    B, T, _ = inputs.shape
    x = jnp.transpose(inputs, (1, 0, 2)).astype(jnp.bfloat16)     # [T, B, E]

    wih_cat = jnp.concatenate([wih[0], wih[1], wih[2]], 1).astype(jnp.bfloat16)
    whh_cat = jnp.concatenate([whh[0], whh[1], whh[2]], 1).astype(jnp.bfloat16)
    bih_cat = jnp.concatenate([bih[0], bih[1], bih[2]])[None, :]
    bhh_cat = jnp.concatenate([bhh[0], bhh[1], bhh[2]])[None, :]

    def step(h, xt):
        gi = jnp.dot(xt, wih_cat, preferred_element_type=jnp.float32) + bih_cat
        gh = jnp.dot(h.astype(jnp.bfloat16), whh_cat,
                     preferred_element_type=jnp.float32) + bhh_cat
        r = jax.nn.sigmoid(gi[:, :H] + gh[:, :H])
        z = jax.nn.sigmoid(gi[:, H:2 * H] + gh[:, H:2 * H])
        n = jnp.tanh(gi[:, 2 * H:] + r * gh[:, 2 * H:])
        h_new = (1.0 - z) * n + z * h
        return h_new, h_new

    _, h_all = lax.scan(step, jnp.zeros((B, H), jnp.float32), x)
    b_idx, t_idx = packed_indices(lengths, T)
    h_packed = h_all[t_idx, b_idx]
    return (jnp.dot(h_packed.astype(jnp.bfloat16), lin_w_t.astype(jnp.bfloat16),
                    preferred_element_type=jnp.float32) + lin_b[None, :])


# ----------------------------------------------------------------------------
# Deterministic parameter construction (nn.GRU / nn.Linear shapes, stored
# pre-transposed for x @ W).  PyTorch gate order (r, z, n).
# ----------------------------------------------------------------------------
def init_params(key, embed_size, hidden_size, vocab_size):
    ks = jax.random.split(key, 7)
    k_gru = 1.0 / np.sqrt(hidden_size)

    embed_w = jax.random.normal(ks[0], (vocab_size, embed_size), jnp.float32)
    wih = jax.random.uniform(ks[1], (3, embed_size, hidden_size),
                             jnp.float32, -k_gru, k_gru)
    whh = jax.random.uniform(ks[2], (3, hidden_size, hidden_size),
                             jnp.float32, -k_gru, k_gru)
    bih = jax.random.uniform(ks[3], (3, hidden_size), jnp.float32, -k_gru, k_gru)
    bhh = jax.random.uniform(ks[4], (3, hidden_size), jnp.float32, -k_gru, k_gru)
    lin_w_t = jax.random.uniform(ks[5], (hidden_size, vocab_size),
                                 jnp.float32, -k_gru, k_gru)
    lin_b = jax.random.uniform(ks[6], (vocab_size,), jnp.float32, -k_gru, k_gru)
    return (embed_w, wih, whh, bih, bhh, lin_w_t, lin_b)


# TODO(synk): sample() / sample_beam_search() are host-side greedy/beam loops
# around the same single-step GRU; not implemented here (forward() only).
# Note: nn.GRU dropout=0.5 is a no-op for num_layers=1 (inter-layer only).

if __name__ == "__main__":
    E, H, V, MAX_LEN = 32, 32, 64, 8

    key = jax.random.PRNGKey(0)
    kp, kf1, kc1, kf2, kc2 = jax.random.split(key, 5)

    raw_params = init_params(kp, E, H, V)
    prep = prepare_params(raw_params)

    # case 1: tiny batch (single batch-split grid axis)
    features1 = jax.random.normal(kf1, (2, E), jnp.float32)
    captions1 = jax.random.randint(kc1, (2, MAX_LEN), 0, V, jnp.int32)
    lengths1 = [8, 5]

    out1 = jax.block_until_ready(decoder_forward(prep, features1, captions1, lengths1))
    ref1 = jax.block_until_ready(
        decoder_forward_ref(raw_params, features1, captions1, lengths1))
    assert out1.shape == (sum(lengths1), V), out1.shape
    np.testing.assert_allclose(np.asarray(out1), np.asarray(ref1),
                               rtol=1e-2, atol=1e-2)

    # case 2: batch padded to 16 -> exercises the 2-way batch-split grid axis
    features2 = jax.random.normal(kf2, (10, E), jnp.float32)
    captions2 = jax.random.randint(kc2, (10, MAX_LEN), 0, V, jnp.int32)
    lengths2 = [8, 5, 7, 3, 6, 8, 2, 4, 1, 7]

    out2 = jax.block_until_ready(decoder_forward(prep, features2, captions2, lengths2))
    ref2 = jax.block_until_ready(
        decoder_forward_ref(raw_params, features2, captions2, lengths2))
    assert out2.shape == (sum(lengths2), V), out2.shape
    np.testing.assert_allclose(np.asarray(out2), np.asarray(ref2),
                               rtol=1e-2, atol=1e-2)

    print("KERNEL_OK")
</pallas_src>

<mosaic_0001>
module attributes {stable_mosaic.version = 11 : i64} {
  func.func @_matmul_bias_kernel_singlek(%arg0: i32, %arg1: i32, %arg2: memref<64x128xbf16, #tpu.memory_space<vmem>>, %arg3: memref<128x384xbf16, #tpu.memory_space<vmem>>, %arg4: memref<1x384xf32, #tpu.memory_space<vmem>>, %arg5: memref<64x384xbf16, #tpu.memory_space<vmem>>) attributes {dimension_semantics = [#tpu.dimension_semantics<parallel>, #tpu.dimension_semantics<parallel>], iteration_bounds = array<i64: 1, 1>, scalar_prefetch = 0 : i64, scratch_operands = 0 : i64, tpu.core_type = #tpu.core_type<tc>, window_params = [{transform_indices = @transform_0, window_bounds = array<i64: 64, 128>}, {transform_indices = @transform_1, window_bounds = array<i64: 128, 384>}, {transform_indices = @transform_2, window_bounds = array<i64: 1, 384>}, {transform_indices = @transform_3, window_bounds = array<i64: 64, 384>}]} {
    %c0 = arith.constant 0 : index
    %c0_0 = arith.constant 0 : index
    %0 = vector.load %arg2[%c0, %c0_0] : memref<64x128xbf16, #tpu.memory_space<vmem>>, vector<64x128xbf16>
    %c0_1 = arith.constant 0 : index
    %c0_2 = arith.constant 0 : index
    %1 = vector.load %arg3[%c0_1, %c0_2] : memref<128x384xbf16, #tpu.memory_space<vmem>>, vector<128x384xbf16>
    %cst = arith.constant dense<0.000000e+00> : vector<64x384xf32>
    %2 = tpu.matmul %0, %1, %cst {dimension_numbers = #tpu.dot_dimension_numbers<[1], [0], [0], [1], [0, 0, 1, 1], [], []>} : vector<64x128xbf16>, vector<128x384xbf16>, vector<64x384xf32> -> vector<64x384xf32>
    %c0_3 = arith.constant 0 : index
    %c0_4 = arith.constant 0 : index
    %3 = vector.load %arg4[%c0_3, %c0_4] : memref<1x384xf32, #tpu.memory_space<vmem>>, vector<1x384xf32>
    %4 = vector.broadcast %3 : vector<1x384xf32> to vector<64x384xf32>
    %5 = arith.addf %2, %4 : vector<64x384xf32>
    %6 = arith.truncf %5 : vector<64x384xf32> to vector<64x384xbf16>
    %c0_5 = arith.constant 0 : index
    %c0_6 = arith.constant 0 : index
    %7 = vector.load %arg5[%c0_5, %c0_6] : memref<64x384xbf16, #tpu.memory_space<vmem>>, vector<64x384xbf16>
    tpu.vector_store %arg5[%c0_5, %c0_6], %6 {strides = array<i32>} : memref<64x384xbf16, #tpu.memory_space<vmem>>, vector<64x384xbf16>,
    return
  }
  func.func @transform_0(%arg0: i32, %arg1: i32) -> (i32, i32) {
    %c0_i32 = arith.constant 0 : i32
    %c0_i32_0 = arith.constant 0 : i32
    return %arg0, %c0_i32 : i32, i32
  }
  func.func @transform_1(%arg0: i32, %arg1: i32) -> (i32, i32) {
    %c0_i32 = arith.constant 0 : i32
    %c0_i32_0 = arith.constant 0 : i32
    return %c0_i32, %arg1 : i32, i32
  }
  func.func @transform_2(%arg0: i32, %arg1: i32) -> (i32, i32) {
    %c0_i32 = arith.constant 0 : i32
    %c0_i32_0 = arith.constant 0 : i32
    return %c0_i32, %arg1 : i32, i32
  }
  func.func @transform_3(%arg0: i32, %arg1: i32) -> (i32, i32) {
    %c0_i32 = arith.constant 0 : i32
    return %arg0, %arg1 : i32, i32
  }
}

</mosaic_0001>

<bundles_post_ra>
// kernel: tpu_custom_call.1
= control target key start
LH: loop header
LB: loop body
LE: loop exit
PB: predicated region body
PF: predicated region fallthrough
CT: control target
= control target key end

     0   :  { %8 = vsyncpa [#allocation3], 0  ;;  %s733_s0 = inlined_call_operand.hbm [shape: bf16[64,128], index: 0, kind: input, shape index: {}]   ;;  %s734_s1 = inlined_call_operand.hbm [shape: bf16[128,384], index: 1, kind: input, shape index: {}]   ;;  %s735_s2 = inlined_call_operand.hbm [shape: f32[1,384], index: 2, kind: input, shape index: {}]   ;;  %s736_s3 = inlined_call_operand.hbm [shape: bf16[64,384], index: 3, kind: output, shape index: {}]  }
   0x1   :  { %9 = vsyncpa [#allocation6], 0  ;;  %s28_s14 = sshll.u32 %s734_s1, 4  ;;  %s29_s14 = int_to_ptr.hbm [resolvable:$true] %s28_s14 }
   0x2   :  { %10 = vsyncpa [#allocation4], 0  ;;  %s657_s15 = smov [#allocation5]   ;;  %s15_s19 = sshll.u32 %s733_s0, 4  ;;  %s16_s19 = int_to_ptr.hbm [resolvable:$true] %s15_s19 }
   0x3   :  { %s30_s16 = sshll.u32 %s657_s15, 4  ;;  %s658_s20 = smov 192   ;;  %s31_s16 = int_to_ptr.vmem [resolvable:$true] %s30_s16 }
   0x4   :  { %s659_s21 = smov 12   ;;  %s660_s22 = smov [#allocation2]  }
   0x5   :  { %36 = dma.hbm_to_vmem [thread:$0]  %s29_s14, 3072, %s31_s16, [#allocation6], %s658_s20, %s658_s20, %s659_s21  }
   0x6   :  { %s17_s23 = sshll.u32 %s660_s22, 4  ;;  %s661_s1 = smov 64   ;;  %s18_s23 = int_to_ptr.vmem [resolvable:$true] %s17_s23 }
   0x7   :  { %s662_s24 = smov 4   ;;  %s42_s27 = sshll.u32 %s735_s2, 4  ;;  %s43_s27 = int_to_ptr.hbm [resolvable:$true] %s42_s27 }
   0x8   :  { %23 = dma.hbm_to_vmem [thread:$0]  %s16_s19, 512, %s18_s23, [#allocation3], %s661_s1, %s661_s1, %s662_s24  }
   0x9   :  { %s663_s28 = smov [#allocation7]  }
   0xa   :  { %s44_s0 = sshll.u32 %s663_s28, 4  ;;  %s45_s0 = int_to_ptr.vmem [resolvable:$true] %s44_s0 }
   0xb   :  { %47 = dma.hbm_to_vmem [thread:$0]  %s43_s27, 48, %s45_s0, [#allocation6]  }
   0xc   :  { %651 = dma.done.wait [#allocation3], 512  }
   0xd   :  { %652 = vsyncadd [#allocation3], 4294966784 }
   0xe   :  { %653 = dma.done.wait [#allocation6], 3120  }
   0xf   :  { %654 = vsyncadd [#allocation6], 4294964176  ;;  %v501_v0 = vld [vmem:[#allocation5 + $0xa8] sm:$0xf]  ;;  %v537_v1 = vld [vmem:[#allocation5 + $0xb0] sm:$0xf0] }
  0x10   :  { %v536_v2 = vld [vmem:[#allocation5 + $0xac] sm:$0xf]  ;;  %v502_v3 = vor.u32 %v537_v1, %v501_v0  ;;  %v503_v4 = vld [vmem:[#allocation5 + $0xb4] sm:$0xf0]  ;;  %v509_v5 = vld [vmem:[#allocation5 + $0xb0] sm:$0xf] }
  0x11   :  { %v538_v6 = vld [vmem:[#allocation5 + $0xb8] sm:$0xf0]  ;;  %v506_v7 = vor.u32 %v536_v2, %v503_v4  ;;  %v489_v9 = vld [vmem:[#allocation5 + $0x90] sm:$0xf]  ;;  %v533_v11 = vld [vmem:[#allocation5 + $0x94] sm:$0xf] }
  0x12   :  { %v510_v8 = vor.u32 %v538_v6, %v509_v5  ;;  %v534_v10 = vld [vmem:[#allocation5 + $0x98] sm:$0xf0]  ;;  %260 = vmatpush.bf16.msra.mxu0 %v502_v3  ;;  %v491_v13 = vld [vmem:[#allocation5 + $0x9c] sm:$0xf0]  ;;  %v497_v14 = vld [vmem:[#allocation5 + $0x98] sm:$0xf]  ;;  %539 = vmatpush.bf16.msra.mxu3 %v502_v3 }
  0x13   :  { %v490_v12 = vor.u32 %v534_v10, %v489_v9  ;;  %v535_v15 = vld [vmem:[#allocation5 + $0xa0] sm:$0xf0]  ;;  %289 = vmatpush.bf16.msra.mxu1 %v506_v7  ;;  %v494_v16 = vor.u32 %v533_v11, %v491_v13  ;;  %v477_v18 = vld [vmem:[#allocation5 + $0x78] sm:$0xf]  ;;  %v530_v20 = vld [vmem:[#allocation5 + $0x7c] sm:$0xf] }
  0x14   :  { %318 = vmatpush.bf16.msra.mxu2 %v510_v8  ;;  %v498_v17 = vor.u32 %v535_v15, %v497_v14  ;;  %v531_v19 = vld [vmem:[#allocation5 + $0x80] sm:$0xf0]  ;;  %v479_v21 = vld [vmem:[#allocation5 + $0x84] sm:$0xf0]  ;;  %v485_v22 = vld [vmem:[#allocation5 + $0x80] sm:$0xf] }
  0x15   :  { %v532_v23 = vld [vmem:[#allocation5 + $0x88] sm:$0xf0]  ;;  %v478_v24 = vor.u32 %v531_v19, %v477_v18  ;;  %v482_v25 = vor.u32 %v530_v20, %v479_v21  ;;  %v465_v27 = vld [vmem:[#allocation5 + $0x60] sm:$0xf]  ;;  %v527_v29 = vld [vmem:[#allocation5 + $0x64] sm:$0xf] }
  0x16   :  { %261 = vmatpush.bf16.msra.mxu0 %v490_v12  ;;  %540 = vmatpush.bf16.msra.mxu3 %v490_v12  ;;  %v486_v26 = vor.u32 %v532_v23, %v485_v22  ;;  %v528_v28 = vld [vmem:[#allocation5 + $0x68] sm:$0xf0]  ;;  %v467_v30 = vld [vmem:[#allocation5 + $0x6c] sm:$0xf0]  ;;  %v473_v31 = vld [vmem:[#allocation5 + $0x68] sm:$0xf] }
  0x17   :  { %290 = vmatpush.bf16.msra.mxu1 %v494_v16  ;;  %v529_v32 = vld [vmem:[#allocation5 + $0x70] sm:$0xf0]  ;;  %v466_v33 = vor.u32 %v528_v28, %v465_v27  ;;  %v470_v34 = vor.u32 %v527_v29, %v467_v30  ;;  %v453_v36 = vld [vmem:[#allocation5 + $0x48] sm:$0xf]  ;;  %v524_v38 = vld [vmem:[#allocation5 + $0x4c] sm:$0xf] }
  0x18   :  { %319 = vmatpush.bf16.msra.mxu2 %v498_v17  ;;  %v474_v35 = vor.u32 %v529_v32, %v473_v31  ;;  %v525_v37 = vld [vmem:[#allocation5 + $0x50] sm:$0xf0]  ;;  %v455_v39 = vld [vmem:[#allocation5 + $0x54] sm:$0xf0]  ;;  %v461_v40 = vld [vmem:[#allocation5 + $0x50] sm:$0xf] }
  0x19   :  { %v526_v41 = vld [vmem:[#allocation5 + $0x58] sm:$0xf0]  ;;  %v454_v42 = vor.u32 %v525_v37, %v453_v36  ;;  %v458_v43 = vor.u32 %v524_v38, %v455_v39  ;;  %v441_v45 = vld [vmem:[#allocation5 + $0x30] sm:$0xf]  ;;  %v521_v47 = vld [vmem:[#allocation5 + $0x34] sm:$0xf] }
  0x1a   :  { %262 = vmatpush.bf16.msra.mxu0 %v478_v24  ;;  %541 = vmatpush.bf16.msra.mxu3 %v478_v24  ;;  %v462_v44 = vor.u32 %v526_v41, %v461_v40  ;;  %v522_v46 = vld [vmem:[#allocation5 + $0x38] sm:$0xf0]  ;;  %v443_v48 = vld [vmem:[#allocation5 + $0x3c] sm:$0xf0]  ;;  %v449_v49 = vld [vmem:[#allocation5 + $0x38] sm:$0xf] }
  0x1b   :  { %291 = vmatpush.bf16.msra.mxu1 %v482_v25  ;;  %v523_v50 = vld [vmem:[#allocation5 + $0x40] sm:$0xf0]  ;;  %v442_v51 = vor.u32 %v522_v46, %v441_v45  ;;  %v446_v52 = vor.u32 %v521_v47, %v443_v48  ;;  %v429_v54 = vld [vmem:[#allocation5 + $0x18] sm:$0xf]  ;;  %v518_v56 = vld [vmem:[#allocation5 + $0x1c] sm:$0xf] }
  0x1c   :  { %320 = vmatpush.bf16.msra.mxu2 %v486_v26  ;;  %v450_v53 = vor.u32 %v523_v50, %v449_v49  ;;  %v519_v55 = vld [vmem:[#allocation5 + $0x20] sm:$0xf0]  ;;  %v431_v57 = vld [vmem:[#allocation5 + $0x24] sm:$0xf0]  ;;  %v437_v58 = vld [vmem:[#allocation5 + $0x20] sm:$0xf] }
  0x1d   :  { %v520_v59 = vld [vmem:[#allocation5 + $0x28] sm:$0xf0]  ;;  %v430_v60 = vor.u32 %v519_v55, %v429_v54  ;;  %v434_v61 = vor.u32 %v518_v56, %v431_v57  ;;  %v417_v63 = vld [vmem:[#allocation5] sm:$0xf]  ;;  %v515_v1 = vld [vmem:[#allocation5 + $0x4] sm:$0xf] }
  0x1e   :  { %263 = vmatpush.bf16.msra.mxu0 %v466_v33  ;;  %542 = vmatpush.bf16.msra.mxu3 %v466_v33  ;;  %v438_v62 = vor.u32 %v520_v59, %v437_v58  ;;  %v516_v0 = vld [vmem:[#allocation5 + $0x8] sm:$0xf0]  ;;  %v419_v2 = vld [vmem:[#allocation5 + $0xc] sm:$0xf0]  ;;  %v425_v3 = vld [vmem:[#allocation5 + $0x8] sm:$0xf] }
  0x1f   :  { %292 = vmatpush.bf16.msra.mxu1 %v470_v34  ;;  %v517_v4 = vld [vmem:[#allocation5 + $0x10] sm:$0xf0]  ;;  %v418_v5 = vor.u32 %v516_v0, %v417_v63  ;;  %v422_v6 = vor.u32 %v515_v1, %v419_v2  ;;  %v511_v8 = vld [vmem:[#allocation2] sm:$0xff]  ;;  %v512_v9 = vld [vmem:[#allocation2 + $0x8] sm:$0xff]  ;;  %s664_s2 = smov [#allocation8]   ;;  %s385_s5 = sshll.u32 %s736_s3, 4  ;;  %s386_s5 = int_to_ptr.hbm [resolvable:$true] %s385_s5 }
  0x20   :  { %321 = vmatpush.bf16.msra.mxu2 %v474_v35  ;;  %v426_v7 = vor.u32 %v517_v4, %v425_v3  ;;  %v513_v10 = vld [vmem:[#allocation2 + $0x10] sm:$0xff]  ;;  %v514_v11 = vld [vmem:[#allocation2 + $0x18] sm:$0xff]  ;;  %v100_v12 = vld [vmem:[#allocation7] sm:$0x7]  ;;  %s383_s29 = sshll.u32 %s664_s2, 4  ;;  %s384_s29 = int_to_ptr.vmem [resolvable:$true] %s383_s29 }
  0x21   :  { %v697_v13 = vperm.slane %v100_v12, 0  ;;  %v699_v14 = vperm.slane %v100_v12, 1  ;;  %v703_v20 = vperm.slane %v100_v12, 2 }
  0x22   :  { %264 = vmatpush.bf16.msra.mxu0 %v454_v42  ;;  %543 = vmatpush.bf16.msra.mxu3 %v454_v42 }
  0x23   :  { %293 = vmatpush.bf16.msra.mxu1 %v458_v43 }
  0x24   :  { %322 = vmatpush.bf16.msra.mxu2 %v462_v44 }
  0x26   :  { %265 = vmatpush.bf16.msra.mxu0 %v442_v51  ;;  %544 = vmatpush.bf16.msra.mxu3 %v442_v51 }
  0x27   :  { %294 = vmatpush.bf16.msra.mxu1 %v446_v52 }
  0x28   :  { %323 = vmatpush.bf16.msra.mxu2 %v450_v53 }
  0x2a   :  { %266 = vmatpush.bf16.msra.mxu0 %v430_v60  ;;  %545 = vmatpush.bf16.msra.mxu3 %v430_v60 }
  0x2b   :  { %295 = vmatpush.bf16.msra.mxu1 %v434_v61 }
  0x2c   :  { %324 = vmatpush.bf16.msra.mxu2 %v438_v62 }
  0x2e   :  { %267 = vmatpush.bf16.msra.mxu0 %v418_v5  ;;  %546 = vmatpush.bf16.msra.mxu3 %v418_v5 }
  0x2f   :  { %296 = vmatpush.bf16.msra.mxu1 %v422_v6 }
  0x30   :  { %325 = vmatpush.bf16.msra.mxu2 %v426_v7 }
  0x31   :  { %268 = vmatmul.bf16.vlgmr.msra.gmra.mxu0 %v511_v8  ;;  %273 = vmatmul.bf16.vlgmr.msra.gmra.mxu3 %v512_v9 }
  0x32   :  { %297 = vmatmul.bf16.vlgmr.msra.gmra.mxu1 %v511_v8 }
  0x33   :  { %326 = vmatmul.bf16.vlgmr.msra.gmra.mxu2 %v511_v8 }
  0x41   :  { %278 = vmatmul.bf16.gmra.mxu3 %v513_v10 }
  0x42   :  { %302 = vmatmul.bf16.gmra.mxu1 %v512_v9 }
  0x43   :  { %331 = vmatmul.bf16.gmra.mxu2 %v512_v9 }
  0x51   :  { %283 = vmatmul.bf16.gmra.mxu3 %v514_v11 }
  0x52   :  { %307 = vmatmul.bf16.gmra.mxu1 %v513_v10 }
  0x53   :  { %336 = vmatmul.bf16.gmra.mxu2 %v513_v10 }
  0x62   :  { %312 = vmatmul.bf16.gmra.mxu1 %v514_v11 }
  0x63   :  { %341 = vmatmul.bf16.gmra.mxu2 %v514_v11 }
  0xae   :  { %v269_v15 = vpop.f32.mrf.mxu0 }
  0xaf   :  { %v270_v16 = vadd.f32 %v269_v15, %v697_v13  ;;  %v298_v17 = vpop.f32.mrf.mxu1 }
  0xb0   :  { %v299_v18 = vadd.f32 %v298_v17, %v699_v14 }
  0xb2   :  { %v347_v19 = vpack.c.bf16 %v299_v18, %v270_v16 }
  0xb4   :  { %363 = vst [vmem:[#allocation8] sm:$0xff] %v347_v19  ;;  %v274_v21 = vpop.f32.mrf.mxu3 }
  0xb5   :  { %v275_v32 = vadd.f32 %v274_v21, %v697_v13 }
  0xb6   :  { %v327_v22 = vpop.f32.mrf.mxu2  ;;  %v271_v24 = vpop.f32.mrf.mxu0 }
  0xb7   :  { %v328_v23 = vadd.f32 %v327_v22, %v703_v20  ;;  %v272_v25 = vadd.f32 %v271_v24, %v697_v13  ;;  %v300_v26 = vpop.f32.mrf.mxu1 }
  0xb8   :  { %v301_v28 = vadd.f32 %v300_v26, %v699_v14 }
  0xb9   :  { %v348_v27 = vpack.c.bf16 %v328_v23, %v328_v23 }
  0xba   :  { %v349_v29 = vpack.c.bf16 %v301_v28, %v272_v25 }
  0xbb   :  { %364 = vst [vmem:[#allocation8 + $0x8] sm:$0xf] %v348_v27 }
  0xbc   :  { %365 = vst [vmem:[#allocation8 + $0xc] sm:$0xff] %v349_v29  ;;  %v276_v31 = vpop.f32.mrf.mxu3 }
  0xbd   :  { %v277_v42 = vadd.f32 %v276_v31, %v697_v13 }
  0xbe   :  { %v329_v30 = vpop.f32.mrf.mxu2 }
  0xbf   :  { %v330_v33 = vadd.f32 %v329_v30, %v703_v20  ;;  %v303_v34 = vpop.f32.mrf.mxu1 }
  0xc0   :  { %v304_v36 = vadd.f32 %v303_v34, %v699_v14 }
  0xc1   :  { %v350_v35 = vpack.c.bf16 %v330_v33, %v330_v33 }
  0xc2   :  { %v351_v37 = vpack.c.bf16 %v304_v36, %v275_v32 }
  0xc3   :  { %366 = vst [vmem:[#allocation8 + $0x14] sm:$0xf] %v350_v35 }
  0xc4   :  { %367 = vst [vmem:[#allocation8 + $0x18] sm:$0xff] %v351_v37  ;;  %v279_v41 = vpop.f32.mrf.mxu3 }
  0xc5   :  { %v280_v47 = vadd.f32 %v279_v41, %v697_v13 }
  0xc6   :  { %v332_v38 = vpop.f32.mrf.mxu2 }
  0xc7   :  { %v333_v39 = vadd.f32 %v332_v38, %v703_v20  ;;  %v305_v40 = vpop.f32.mrf.mxu1 }
  0xc8   :  { %v306_v44 = vadd.f32 %v305_v40, %v699_v14 }
  0xc9   :  { %v352_v43 = vpack.c.bf16 %v333_v39, %v333_v39 }
  0xca   :  { %v353_v45 = vpack.c.bf16 %v306_v44, %v277_v42 }
  0xcb   :  { %368 = vst [vmem:[#allocation8 + $0x20] sm:$0xf] %v352_v43 }
  0xcc   :  { %369 = vst [vmem:[#allocation8 + $0x24] sm:$0xff] %v353_v45  ;;  %v281_v52 = vpop.f32.mrf.mxu3 }
  0xcd   :  { %v282_v57 = vadd.f32 %v281_v52, %v697_v13 }
  0xce   :  { %v334_v46 = vpop.f32.mrf.mxu2 }
  0xcf   :  { %v335_v48 = vadd.f32 %v334_v46, %v703_v20  ;;  %v308_v49 = vpop.f32.mrf.mxu1 }
  0xd0   :  { %v309_v51 = vadd.f32 %v308_v49, %v699_v14 }
  0xd1   :  { %v354_v50 = vpack.c.bf16 %v335_v48, %v335_v48 }
  0xd2   :  { %v355_v53 = vpack.c.bf16 %v309_v51, %v280_v47 }
  0xd3   :  { %370 = vst [vmem:[#allocation8 + $0x2c] sm:$0xf] %v354_v50 }
  0xd4   :  { %371 = vst [vmem:[#allocation8 + $0x30] sm:$0xff] %v355_v53  ;;  %v284_v61 = vpop.f32.mrf.mxu3 }
  0xd5   :  { %v285_v63 = vadd.f32 %v284_v61, %v697_v13 }
  0xd6   :  { %v337_v54 = vpop.f32.mrf.mxu2 }
  0xd7   :  { %v338_v55 = vadd.f32 %v337_v54, %v703_v20  ;;  %v310_v56 = vpop.f32.mrf.mxu1 }
  0xd8   :  { %v311_v59 = vadd.f32 %v310_v56, %v699_v14 }
  0xd9   :  { %v356_v58 = vpack.c.bf16 %v338_v55, %v338_v55 }
  0xda   :  { %v357_v60 = vpack.c.bf16 %v311_v59, %v282_v57 }
  0xdb   :  { %372 = vst [vmem:[#allocation8 + $0x38] sm:$0xf] %v356_v58 }
  0xdc   :  { %373 = vst [vmem:[#allocation8 + $0x3c] sm:$0xff] %v357_v60  ;;  %v286_v5 = vpop.f32.mrf.mxu3 }
  0xdd   :  { %v287_v9 = vadd.f32 %v286_v5, %v697_v13 }
  0xde   :  { %v339_v62 = vpop.f32.mrf.mxu2 }
  0xdf   :  { %v340_v0 = vadd.f32 %v339_v62, %v703_v20  ;;  %v313_v1 = vpop.f32.mrf.mxu1 }
  0xe0   :  { %v314_v3 = vadd.f32 %v313_v1, %v699_v14 }
  0xe1   :  { %v358_v2 = vpack.c.bf16 %v340_v0, %v340_v0 }
  0xe2   :  { %v359_v4 = vpack.c.bf16 %v314_v3, %v285_v63 }
  0xe3   :  { %374 = vst [vmem:[#allocation8 + $0x44] sm:$0xf] %v358_v2 }
  0xe4   :  { %375 = vst [vmem:[#allocation8 + $0x48] sm:$0xff] %v359_v4 }
  0xe6   :  { %v342_v6 = vpop.f32.mrf.mxu2 }
  0xe7   :  { %v343_v7 = vadd.f32 %v342_v6, %v703_v20  ;;  %v315_v8 = vpop.f32.mrf.mxu1 }
  0xe8   :  { %v316_v11 = vadd.f32 %v315_v8, %v699_v14 }
  0xe9   :  { %v360_v10 = vpack.c.bf16 %v343_v7, %v343_v7 }
  0xea   :  { %v361_v12 = vpack.c.bf16 %v316_v11, %v287_v9 }
  0xeb   :  { %376 = vst [vmem:[#allocation8 + $0x50] sm:$0xf] %v360_v10 }
  0xec   :  { %377 = vst [vmem:[#allocation8 + $0x54] sm:$0xff] %v361_v12 }
  0xee   :  { %v344_v15 = vpop.f32.mrf.mxu2 }
  0xef   :  { %v345_v16 = vadd.f32 %v344_v15, %v703_v20 }
  0xf1   :  { %v362_v17 = vpack.c.bf16 %v345_v16, %v345_v16 }
  0xf3   :  { %378 = vst [vmem:[#allocation8 + $0x5c] sm:$0xf] %v362_v17 }
  0xf4   :  { %391 = dma.vmem_to_hbm [thread:$0]  %s384_s29, 1536, %s386_s5, [#allocation4], %s658_s20, %s658_s20, %s659_s21  }
  0xf5   :  { %655 = dma.done.wait [#allocation4], 1536  }
  0xf6   :  { %656 = vsyncadd [#allocation4], 4294965760 }
  0xf7   :  { %396 = vsyncpa [#allocation3], 1 }
  0xf8   :  { %397 = vsyncpa [#allocation6], 1 }
  0xf9   :  { %398 = vsyncpa [#allocation4], 1 }

</bundles_post_ra>
